<compile_context>
chip_gen: v5e
topology: v5e:2x2
jax: 0.10.0
libtpu: 0.0.40
codegen_flags: <defaults>
</compile_context>

<pallas_src>
import functools

import jax
import jax.numpy as jnp
from jax.experimental import pallas as pl
from jax.experimental.pallas import tpu as pltpu


def _round_up(x, m):
    return ((x + m - 1) // m) * m


def vgae_kernel(a_ref, x_ref, w0_ref, wh_ref, eps_ref,
                adj_ref, head_ref, z_ref, *, h2p):
    """Fused VGAE forward on (lightly) padded tiles.

    hidden        = relu(A @ (X @ W0))
    ah            = A @ hidden                    (computed once, shared)
    [mu | logvar] = ah @ [Wmu | Wlv]              (single fused head matmul)
    z             = mu + eps * exp(0.5 * logvar)
    adj_rec       = sigmoid(z z^T)                (dot_general, no transpose)
    """
    bf16 = jnp.bfloat16
    a = a_ref[...]            # bf16 [Np, Np]   (Np = round_up(N, 16))

    # ---- GCN layer 1 ----
    xw = jnp.dot(x_ref[...], w0_ref[...], preferred_element_type=jnp.float32)
    hidden = jnp.maximum(
        jnp.dot(a, xw.astype(bf16), preferred_element_type=jnp.float32), 0.0)

    # ---- Shared A @ hidden, then fused mu/logvar head ----
    ah = jnp.dot(a, hidden.astype(bf16), preferred_element_type=jnp.float32)
    head = jnp.dot(ah.astype(bf16), wh_ref[...],
                   preferred_element_type=jnp.float32)   # f32 [Np, 2*h2p]
    mu = head[:, :h2p]          # lane-aligned split (h2p is a multiple of 128)
    logvar = head[:, h2p:]

    # ---- Reparameterization (f32 VPU/EUP) ----
    z = mu + eps_ref[...] * jnp.exp(0.5 * logvar)

    # ---- Inner-product decoder: contract last axes, no z.T materialized ----
    zb = z.astype(bf16)
    logits = jax.lax.dot_general(zb, zb, (((1,), (1,)), ((), ())),
                                 preferred_element_type=jnp.float32)
    # sigmoid as a single EUP op: sigmoid(x) = 0.5 * (tanh(0.5 x) + 1)
    adj_ref[...] = 0.5 * (jnp.tanh(0.5 * logits) + 1.0)

    head_ref[...] = head        # one fused store for [mu | logvar]
    z_ref[...] = z


def init_vgae_params(key, d, h1, h2):
    """One-time parameter creation + MXU-ready (padded, bf16) preprocessing."""
    def _glorot(k, shape):
        limit = jnp.sqrt(6.0 / (shape[0] + shape[1]))
        return jax.random.uniform(k, shape, jnp.float32, -limit, limit)

    k_w0, k_wmu, k_wlv = jax.random.split(key, 3)
    w0 = _glorot(k_w0, (d, h1))
    wmu = _glorot(k_wmu, (h1, h2))
    wlv = _glorot(k_wlv, (h1, h2))

    dp, h1p, h2p = _round_up(d, 128), _round_up(h1, 128), _round_up(h2, 128)
    w0_p = jnp.pad(w0, ((0, dp - d), (0, h1p - h1))).astype(jnp.bfloat16)
    # Fused head weights: each head padded to its own 128-lane slab so the
    # in-kernel mu/logvar split lands on a lane boundary.
    wh_p = jnp.concatenate(
        [jnp.pad(wmu, ((0, h1p - h1), (0, h2p - h2))),
         jnp.pad(wlv, ((0, h1p - h1), (0, h2p - h2)))],
        axis=1).astype(jnp.bfloat16)
    return (w0, wmu, wlv), (w0_p, wh_p)


@jax.jit
def vgae_forward(a_norm, x, eps, w0_p, wh_p):
    n, d = x.shape
    h2 = eps.shape[1]
    dp, h1p = w0_p.shape
    h2p = wh_p.shape[1] // 2
    assert a_norm.shape == (n, n) and eps.shape == (n, h2)

    # N only needs the bf16 sublane pad (16); feature dims are already
    # 128-padded in the pre-processed weights.
    np_ = _round_up(n, 16)

    # Activation pad/cast -- under jit these fuse with the kernel's HBM->VMEM
    # transfer instead of materializing standalone padded copies.
    a_p = jnp.pad(a_norm, ((0, np_ - n), (0, np_ - n))).astype(jnp.bfloat16)
    x_p = jnp.pad(x, ((0, np_ - n), (0, dp - d))).astype(jnp.bfloat16)
    eps_p = jnp.pad(eps, ((0, np_ - n), (0, h2p - h2)))        # stays f32

    vmem = pl.BlockSpec(memory_space=pltpu.MemorySpace.VMEM)
    out_shapes = (
        jax.ShapeDtypeStruct((np_, np_), jnp.float32),       # adj_rec
        jax.ShapeDtypeStruct((np_, 2 * h2p), jnp.float32),   # [mu | logvar]
        jax.ShapeDtypeStruct((np_, h2p), jnp.float32),       # z
    )

    flops = 2 * (np_ * dp * h1p          # X @ W0
                 + 2 * np_ * np_ * h1p   # A @ xw, A @ hidden
                 + np_ * h1p * 2 * h2p   # fused head matmul
                 + np_ * np_ * h2p)      # z z^T
    transcendentals = np_ * np_ + np_ * h2p          # tanh + exp
    bytes_accessed = (2 * (a_p.size + x_p.size + w0_p.size + wh_p.size)
                      + 4 * eps_p.size
                      + 4 * (np_ * np_ + np_ * 2 * h2p + np_ * h2p))

    adj_p, head_p, z_p = pl.pallas_call(
        functools.partial(vgae_kernel, h2p=h2p),
        out_shape=out_shapes,
        in_specs=[vmem] * 5,
        out_specs=(vmem, vmem, vmem),
        cost_estimate=pl.CostEstimate(flops=flops,
                                      transcendentals=transcendentals,
                                      bytes_accessed=bytes_accessed),
    )(a_p, x_p, w0_p, wh_p, eps_p)

    # Slice the real (unpadded) results back out (fused under the same jit).
    mu = head_p[:n, :h2]
    logvar = head_p[:n, h2p:h2p + h2]
    return adj_p[:n, :n], mu, logvar, z_p[:n, :h2]


if __name__ == "__main__":
    # Small, deterministic problem: 16 nodes, 32 input feats, 32 hidden, 16 latent.
    N, D, H1, H2 = 16, 32, 32, 16

    key = jax.random.PRNGKey(0)
    k_x, k_a, k_params, k_eps = jax.random.split(key, 4)

    # Node features.
    x = jax.random.normal(k_x, (N, D), jnp.float32)

    # Random symmetric adjacency with self-loops, symmetrically normalized
    # (graph preprocessing stays plain JAX; it is data prep, not the forward).
    a_raw = (jax.random.uniform(k_a, (N, N)) < 0.3).astype(jnp.float32)
    a_sym = jnp.clip(a_raw + a_raw.T, 0.0, 1.0)
    a_sym = a_sym + jnp.eye(N, dtype=jnp.float32)
    deg = jnp.sum(a_sym, axis=1)
    d_inv_sqrt = 1.0 / jnp.sqrt(deg)
    a_norm = a_sym * d_inv_sqrt[:, None] * d_inv_sqrt[None, :]

    # One-time parameter init + preprocessing (hoisted out of the forward path).
    (w0, wmu, wlv), (w0_p, wh_p) = init_vgae_params(k_params, D, H1, H2)

    # Reparameterization noise (deterministic via PRNGKey(0) split).
    eps = jax.random.normal(k_eps, (N, H2), jnp.float32)

    adj_rec, mu, logvar, z = vgae_forward(a_norm, x, eps, w0_p, wh_p)
    jax.block_until_ready((adj_rec, mu, logvar, z))

    # ---- Mirrored pure-JAX reference (same reassociation + bf16 operand casts) ----
    bf = jnp.bfloat16
    a_b = a_norm.astype(bf)
    xw_r = jnp.dot(x.astype(bf), w0.astype(bf), preferred_element_type=jnp.float32)
    h_r = jnp.maximum(
        jnp.dot(a_b, xw_r.astype(bf), preferred_element_type=jnp.float32), 0.0)
    ah_r = jnp.dot(a_b, h_r.astype(bf), preferred_element_type=jnp.float32)
    mu_r = jnp.dot(ah_r.astype(bf), wmu.astype(bf), preferred_element_type=jnp.float32)
    lv_r = jnp.dot(ah_r.astype(bf), wlv.astype(bf), preferred_element_type=jnp.float32)
    z_r = mu_r + eps * jnp.exp(0.5 * lv_r)
    zb_r = z_r.astype(bf)
    adj_r = jax.nn.sigmoid(
        jax.lax.dot_general(zb_r, zb_r, (((1,), (1,)), ((), ())),
                            preferred_element_type=jnp.float32))

    assert jnp.allclose(mu, mu_r, atol=1e-2, rtol=1e-2)
    assert jnp.allclose(logvar, lv_r, atol=1e-2, rtol=1e-2)
    assert jnp.allclose(z, z_r, atol=1e-2, rtol=1e-2)
    assert jnp.allclose(adj_rec, adj_r, atol=1e-2, rtol=1e-2)

    # Loose check against full-f32 canonical math (semantics preserved).
    mu_f32 = a_norm @ (jnp.maximum(a_norm @ (x @ w0), 0.0) @ wmu)
    assert jnp.allclose(mu, mu_f32, atol=0.1)

    print("KERNEL_OK")
</pallas_src>

<mosaic_0001>
module attributes {stable_mosaic.version = 11 : i64} {
  func.func @vgae_kernel(%arg0: memref<16x16xbf16, #tpu.memory_space<vmem>>, %arg1: memref<16x128xbf16, #tpu.memory_space<vmem>>, %arg2: memref<128x128xbf16, #tpu.memory_space<vmem>>, %arg3: memref<128x256xbf16, #tpu.memory_space<vmem>>, %arg4: memref<16x128xf32, #tpu.memory_space<vmem>>, %arg5: memref<16x16xf32, #tpu.memory_space<vmem>>, %arg6: memref<16x256xf32, #tpu.memory_space<vmem>>, %arg7: memref<16x128xf32, #tpu.memory_space<vmem>>) attributes {dimension_semantics = [], scalar_prefetch = 0 : i64, scratch_operands = 0 : i64, tpu.core_type = #tpu.core_type<tc>} {
    %c0 = arith.constant 0 : index
    %c0_0 = arith.constant 0 : index
    %0 = vector.load %arg0[%c0, %c0_0] : memref<16x16xbf16, #tpu.memory_space<vmem>>, vector<16x16xbf16>
    %c0_1 = arith.constant 0 : index
    %c0_2 = arith.constant 0 : index
    %1 = vector.load %arg1[%c0_1, %c0_2] : memref<16x128xbf16, #tpu.memory_space<vmem>>, vector<16x128xbf16>
    %c0_3 = arith.constant 0 : index
    %c0_4 = arith.constant 0 : index
    %2 = vector.load %arg2[%c0_3, %c0_4] : memref<128x128xbf16, #tpu.memory_space<vmem>>, vector<128x128xbf16>
    %cst = arith.constant dense<0.000000e+00> : vector<16x128xf32>
    %3 = tpu.matmul %1, %2, %cst {dimension_numbers = #tpu.dot_dimension_numbers<[1], [0], [0], [1], [0, 0, 1, 1], [], []>} : vector<16x128xbf16>, vector<128x128xbf16>, vector<16x128xf32> -> vector<16x128xf32>
    %4 = arith.truncf %3 : vector<16x128xf32> to vector<16x128xbf16>
    %cst_5 = arith.constant dense<0.000000e+00> : vector<16x128xf32>
    %5 = tpu.matmul %0, %4, %cst_5 {dimension_numbers = #tpu.dot_dimension_numbers<[1], [0], [0], [1], [0, 0, 1, 1], [], []>} : vector<16x16xbf16>, vector<16x128xbf16>, vector<16x128xf32> -> vector<16x128xf32>
    %cst_6 = arith.constant 0.000000e+00 : f32
    %6 = vector.broadcast %cst_6 : f32 to vector<16x128xf32>
    %7 = arith.maximumf %5, %6 : vector<16x128xf32>
    %8 = arith.truncf %7 : vector<16x128xf32> to vector<16x128xbf16>
    %cst_7 = arith.constant dense<0.000000e+00> : vector<16x128xf32>
    %9 = tpu.matmul %0, %8, %cst_7 {dimension_numbers = #tpu.dot_dimension_numbers<[1], [0], [0], [1], [0, 0, 1, 1], [], []>} : vector<16x16xbf16>, vector<16x128xbf16>, vector<16x128xf32> -> vector<16x128xf32>
    %10 = arith.truncf %9 : vector<16x128xf32> to vector<16x128xbf16>
    %c0_8 = arith.constant 0 : index
    %c0_9 = arith.constant 0 : index
    %11 = vector.load %arg3[%c0_8, %c0_9] : memref<128x256xbf16, #tpu.memory_space<vmem>>, vector<128x256xbf16>
    %cst_10 = arith.constant dense<0.000000e+00> : vector<16x256xf32>
    %12 = tpu.matmul %10, %11, %cst_10 {dimension_numbers = #tpu.dot_dimension_numbers<[1], [0], [0], [1], [0, 0, 1, 1], [], []>} : vector<16x128xbf16>, vector<128x256xbf16>, vector<16x256xf32> -> vector<16x256xf32>
    %13 = vector.extract_strided_slice %12 {offsets = [0, 0], sizes = [16, 128], strides = [1, 1]} : vector<16x256xf32> to vector<16x128xf32>
    %14 = vector.extract_strided_slice %12 {offsets = [0, 128], sizes = [16, 128], strides = [1, 1]} : vector<16x256xf32> to vector<16x128xf32>
    %c0_11 = arith.constant 0 : index
    %c0_12 = arith.constant 0 : index
    %15 = vector.load %arg4[%c0_11, %c0_12] : memref<16x128xf32, #tpu.memory_space<vmem>>, vector<16x128xf32>
    %cst_13 = arith.constant 5.000000e-01 : f32
    %16 = vector.broadcast %cst_13 : f32 to vector<16x128xf32>
    %17 = arith.mulf %16, %14 : vector<16x128xf32>
    %18 = math.exp %17 : vector<16x128xf32>
    %19 = arith.mulf %15, %18 : vector<16x128xf32>
    %20 = arith.addf %13, %19 : vector<16x128xf32>
    %21 = arith.truncf %20 : vector<16x128xf32> to vector<16x128xbf16>
    %cst_14 = arith.constant dense<0.000000e+00> : vector<16x16xf32>
    %22 = tpu.matmul %21, %21, %cst_14 {dimension_numbers = #tpu.dot_dimension_numbers<[1], [1], [0], [0], [0, 0, 1, 0], [], []>} : vector<16x128xbf16>, vector<16x128xbf16>, vector<16x16xf32> -> vector<16x16xf32>
    %cst_15 = arith.constant 5.000000e-01 : f32
    %23 = vector.broadcast %cst_15 : f32 to vector<16x16xf32>
    %24 = arith.mulf %23, %22 : vector<16x16xf32>
    %25 = math.tanh %24 : vector<16x16xf32>
    %cst_16 = arith.constant 1.000000e+00 : f32
    %26 = vector.broadcast %cst_16 : f32 to vector<16x16xf32>
    %27 = arith.addf %25, %26 : vector<16x16xf32>
    %cst_17 = arith.constant 5.000000e-01 : f32
    %28 = vector.broadcast %cst_17 : f32 to vector<16x16xf32>
    %29 = arith.mulf %28, %27 : vector<16x16xf32>
    %c0_18 = arith.constant 0 : index
    %c0_19 = arith.constant 0 : index
    %30 = vector.load %arg5[%c0_18, %c0_19] : memref<16x16xf32, #tpu.memory_space<vmem>>, vector<16x16xf32>
    tpu.vector_store %arg5[%c0_18, %c0_19], %29 {strides = array<i32>} : memref<16x16xf32, #tpu.memory_space<vmem>>, vector<16x16xf32>,
    %c0_20 = arith.constant 0 : index
    %c0_21 = arith.constant 0 : index
    %31 = vector.load %arg6[%c0_20, %c0_21] : memref<16x256xf32, #tpu.memory_space<vmem>>, vector<16x256xf32>
    tpu.vector_store %arg6[%c0_20, %c0_21], %12 {strides = array<i32>} : memref<16x256xf32, #tpu.memory_space<vmem>>, vector<16x256xf32>,
    %c0_22 = arith.constant 0 : index
    %c0_23 = arith.constant 0 : index
    %32 = vector.load %arg7[%c0_22, %c0_23] : memref<16x128xf32, #tpu.memory_space<vmem>>, vector<16x128xf32>
    tpu.vector_store %arg7[%c0_22, %c0_23], %20 {strides = array<i32>} : memref<16x128xf32, #tpu.memory_space<vmem>>, vector<16x128xf32>,
    return
  }
}

</mosaic_0001>

<bundles_post_ra>
// kernel: vgae_forward.1
= control target key start
LH: loop header
LB: loop body
LE: loop exit
PB: predicated region body
PF: predicated region fallthrough
CT: control target
= control target key end

     0   :  { %13 = vsyncpa [#allocation3], 0  ;;  %s718_s0 = inlined_call_operand.vmem [shape: bf16[16,16], index: 0, kind: input, shape index: {}]   ;;  %s719_s1 = inlined_call_operand.vmem [shape: bf16[16,128], index: 1, kind: input, shape index: {}]   ;;  %s720_s2 = inlined_call_operand.vmem [shape: bf16[128,128], index: 2, kind: input, shape index: {}]   ;;  %s721_s3 = inlined_call_operand.hbm [shape: bf16[128,256], index: 3, kind: input, shape index: {}]   ;;  %s722_s4 = inlined_call_operand.vmem [shape: f32[16,128], index: 4, kind: input, shape index: {}]   ;;  %s723_s5 = inlined_call_operand.hbm [shape: f32[16,16], index: 5, kind: output, shape index: {0}]   ;;  %s724_s6 = inlined_call_operand.vmem [shape: f32[16,256], index: 6, kind: output, shape index: {1}]   ;;  %s725_s7 = inlined_call_operand.hbm [shape: f32[16,128], index: 7, kind: output, shape index: {2}]  }
   0x1   :  { %14 = vsyncpa [#allocation4], 0 }
   0x2   :  { %15 = vsyncpa [#allocation7], 0  ;;  %s26_s26 = sshll.u32 %s721_s3, 4  ;;  %s603_s27 = smov [#allocation2]   ;;  %s27_s26 = int_to_ptr.hbm [resolvable:$true] %s26_s26 }
   0x3   :  { %s28_s28 = sshll.u32 %s603_s27, 4  ;;  %s604_s29 = smov 128   ;;  %s29_s28 = int_to_ptr.vmem [resolvable:$true] %s28_s28 }
   0x4   :  { %s605_s30 = smov 8  }
   0x5   :  { %34 = dma.hbm_to_vmem [thread:$0]  %s27_s26, 2048, %s29_s28, [#allocation3], %s604_s29, %s604_s29, %s605_s30  }
   0x6   :  { %597 = dma.done.wait [#allocation3], 2048  }
   0x7   :  { %598 = vsyncadd [#allocation3], 4294965248  ;;  %v495_v0 = vld [vmem:[%s720_s2 + $0x38] sm:$0xff]  ;;  %v494_v1 = vld [vmem:[%s720_s2 + $0x30] sm:$0xff]  ;;  %vm136_vm0 = vcmask 130048   ;;  %s606_s14 = smov [#allocation6]  }
   0x8   :  { %116 = vmatpush.bf16.msra.mxu0 %v495_v0  ;;  %v493_v2 = vld [vmem:[%s720_s2 + $0x28] sm:$0xff]  ;;  %v492_v3 = vld [vmem:[%s720_s2 + $0x20] sm:$0xff]  ;;  %v491_v4 = vld [vmem:[%s720_s2 + $0x18] sm:$0xff]  ;;  %s358_s15 = sshll.u32 %s606_s14, 4  ;;  %s360_s18 = sshll.u32 %s725_s7, 4  ;;  %s359_s15 = int_to_ptr.vmem [resolvable:$true] %s358_s15  ;;  %s361_s18 = int_to_ptr.hbm [resolvable:$true] %s360_s18 }
   0x9   :  { %v490_v5 = vld [vmem:[%s720_s2 + $0x10] sm:$0xff]  ;;  %v489_v6 = vld [vmem:[%s720_s2 + $0x8] sm:$0xff]  ;;  %v488_v7 = vld [vmem:[%s720_s2] sm:$0xff]  ;;  %s345_s20 = sshll.u32 %s723_s5, 4  ;;  %s346_s20 = int_to_ptr.hbm [resolvable:$true] %s345_s20 }
   0xa   :  { %v487_v8 = vld [vmem:[%s719_s1] sm:$0xff]  ;;  %v480_v13 = vld [vmem:[#allocation2 + $0x70] sm:$0xf]  ;;  %v511_v14 = vld [vmem:[#allocation2 + $0x74] sm:$0xf0] }
   0xb   :  { %v486_v12 = vld [vmem:[%s718_s0] sm:$0xff]  ;;  %v510_v15 = vld [vmem:[#allocation2 + $0x74] sm:$0xf]  ;;  %v481_v16 = vor.u32 %v511_v14, %v480_v13  ;;  %v482_v17 = vld [vmem:[#allocation2 + $0x78] sm:$0xf0] }
   0xc   :  { %117 = vmatpush.bf16.msra.mxu0 %v494_v1  ;;  %v472_v18 = vld [vmem:[#allocation2 + $0x60] sm:$0xf]  ;;  %v509_v19 = vld [vmem:[#allocation2 + $0x64] sm:$0xf0]  ;;  %v485_v20 = vor.u32 %v510_v15, %v482_v17  ;;  %v508_v21 = vld [vmem:[#allocation2 + $0x64] sm:$0xf] }
   0xd   :  { %v474_v22 = vld [vmem:[#allocation2 + $0x68] sm:$0xf0]  ;;  %268 = vmatpush.bf16.msra.mxu3 %v481_v16  ;;  %v473_v23 = vor.u32 %v509_v19, %v472_v18  ;;  %v464_v25 = vld [vmem:[#allocation2 + $0x50] sm:$0xf]  ;;  %v507_v26 = vld [vmem:[#allocation2 + $0x54] sm:$0xf0] }
   0xe   :  { %v477_v24 = vor.u32 %v508_v21, %v474_v22  ;;  %v506_v27 = vld [vmem:[#allocation2 + $0x54] sm:$0xf]  ;;  %v466_v28 = vld [vmem:[#allocation2 + $0x58] sm:$0xf0]  ;;  %v465_v29 = vor.u32 %v507_v26, %v464_v25  ;;  %v456_v31 = vld [vmem:[#allocation2 + $0x40] sm:$0xf] }
   0xf   :  { %v469_v30 = vor.u32 %v506_v27, %v466_v28  ;;  %v505_v32 = vld [vmem:[#allocation2 + $0x44] sm:$0xf0]  ;;  %v504_v33 = vld [vmem:[#allocation2 + $0x44] sm:$0xf]  ;;  %v458_v34 = vld [vmem:[#allocation2 + $0x48] sm:$0xf0] }
  0x10   :  { %118 = vmatpush.bf16.msra.mxu0 %v493_v2  ;;  %v457_v35 = vor.u32 %v505_v32, %v456_v31  ;;  %v461_v36 = vor.u32 %v504_v33, %v458_v34  ;;  %v448_v37 = vld [vmem:[#allocation2 + $0x30] sm:$0xf]  ;;  %v503_v38 = vld [vmem:[#allocation2 + $0x34] sm:$0xf0]  ;;  %v502_v39 = vld [vmem:[#allocation2 + $0x34] sm:$0xf] }
  0x11   :  { %269 = vmatpush.bf16.msra.mxu3 %v473_v23  ;;  %v450_v40 = vld [vmem:[#allocation2 + $0x38] sm:$0xf0]  ;;  %v449_v41 = vor.u32 %v503_v38, %v448_v37  ;;  %v440_v48 = vld [vmem:[#allocation2 + $0x20] sm:$0xf]  ;;  %v501_v49 = vld [vmem:[#allocation2 + $0x24] sm:$0xf0] }
  0x12   :  { %v453_v43 = vor.u32 %v502_v39, %v450_v40  ;;  %v500_v50 = vld [vmem:[#allocation2 + $0x24] sm:$0xf]  ;;  %v441_v51 = vor.u32 %v501_v49, %v440_v48  ;;  %v442_v52 = vld [vmem:[#allocation2 + $0x28] sm:$0xf0]  ;;  %v432_v54 = vld [vmem:[#allocation2 + $0x10] sm:$0xf] }
  0x13   :  { %v445_v53 = vor.u32 %v500_v50, %v442_v52  ;;  %v499_v55 = vld [vmem:[#allocation2 + $0x14] sm:$0xf0]  ;;  %v498_v56 = vld [vmem:[#allocation2 + $0x14] sm:$0xf]  ;;  %v434_v58 = vld [vmem:[#allocation2 + $0x18] sm:$0xf0] }
  0x14   :  { %119 = vmatpush.bf16.msra.mxu0 %v492_v3  ;;  %v433_v57 = vor.u32 %v499_v55, %v432_v54  ;;  %v437_v59 = vor.u32 %v498_v56, %v434_v58  ;;  %v424_v60 = vld [vmem:[#allocation2] sm:$0xf]  ;;  %v497_v61 = vld [vmem:[#allocation2 + $0x4] sm:$0xf0]  ;;  %v496_v62 = vld [vmem:[#allocation2 + $0x4] sm:$0xf] }
  0x15   :  { %270 = vmatpush.bf16.msra.mxu3 %v465_v29  ;;  %v425_v63 = vor.u32 %v497_v61, %v424_v60  ;;  %v426_v0 = vld [vmem:[#allocation2 + $0x8] sm:$0xf0] }
  0x16   :  { %v429_v1 = vor.u32 %v496_v62, %v426_v0  ;;  %v297_v17 = vld [vmem:[%s722_s4 + $0x8] sm:$0xff] }
  0x18   :  { %120 = vmatpush.bf16.msra.mxu0 %v491_v4 }
  0x19   :  { %271 = vmatpush.bf16.msra.mxu3 %v457_v35 }
  0x1c   :  { %121 = vmatpush.bf16.msra.mxu0 %v490_v5 }
  0x1d   :  { %272 = vmatpush.bf16.msra.mxu3 %v449_v41 }
  0x20   :  { %122 = vmatpush.bf16.msra.mxu0 %v489_v6 }
  0x21   :  { %273 = vmatpush.bf16.msra.mxu3 %v441_v51 }
  0x24   :  { %123 = vmatpush.bf16.msra.mxu0 %v488_v7 }
  0x25   :  { %274 = vmatpush.bf16.msra.mxu3 %v433_v57 }
  0x27   :  { %124 = vmatmul.bf16.vlgmr.msra.gmra.mxu0 %v487_v8 }
  0x29   :  { %275 = vmatpush.bf16.msra.mxu3 %v425_v63 }
  0xa4   :  { %v125_v9 = vpop.f32.mrf.mxu0 }
  0xac   :  { %v127_v10 = vpop.f32.mrf.mxu0 }
  0xad   :  { %v130_v11 = vpack.c.bf16 %v127_v10, %v125_v9  ;;  %v296_v10 = vld [vmem:[%s722_s4] sm:$0xff]  ;;  %s607_s4 = smov [#allocation5]  }
  0xaf   :  { %147 = vmatpush.bf16.msra.mxu1 %v130_v11 }
  0xb2   :  { %420 = vmatmul.msk.bf16.vlgmr.msra.gmra.mxu1 %vm136_vm0, %v486_v12 }
  0xb3   :  { %282 = vmatpush.bf16.msrb.mxu1 %v485_v20 }
  0xb7   :  { %283 = vmatpush.bf16.msrb.mxu1 %v477_v24 }
  0xbb   :  { %284 = vmatpush.bf16.msrb.mxu1 %v469_v30 }
  0xbf   :  { %285 = vmatpush.bf16.msrb.mxu1 %v461_v36 }
  0xc3   :  { %286 = vmatpush.bf16.msrb.mxu1 %v453_v43 }
  0xc7   :  { %287 = vmatpush.bf16.msrb.mxu1 %v445_v53 }
  0xcb   :  { %288 = vmatpush.bf16.msrb.mxu1 %v437_v59 }
  0xcf   :  { %289 = vmatpush.bf16.msrb.mxu1 %v429_v1 }
 0x12f   :  { %v149_v42 = vpop.f32.mrf.mxu1 }
 0x130   :  { %v154_v45 = vmax.f32 %v149_v42, 0.0 }
 0x137   :  { %v151_v44 = vpop.f32.mrf.mxu1 }
 0x138   :  { %v155_v46 = vmax.f32 %v151_v44, 0.0 }
 0x13a   :  { %v156_v47 = vpack.c.bf16 %v155_v46, %v154_v45 }
 0x13c   :  { %164 = vmatpush.bf16.msra.mxu2 %v156_v47 }
 0x13f   :  { %421 = vmatmul.msk.bf16.vlgmr.msra.gmra.mxu2 %vm136_vm0, %v486_v12 }
 0x1c2   :  { %v166_v2 = vpop.f32.mrf.mxu2 }
 0x1ca   :  { %v168_v3 = vpop.f32.mrf.mxu2 }
 0x1cb   :  { %v171_v4 = vpack.c.bf16 %v168_v3, %v166_v2 }
 0x1cd   :  { %276 = vmatmul.bf16.vlgmr.msra.gmra.mxu3 %v171_v4  ;;  %290 = vmatmul.bf16.vlgmr.msrb.gmra.mxu1 %v171_v4 }
 0x24a   :  { %v291_v5 = vpop.f32.mrf.mxu1 }
 0x24b   :  { %v298_v6 = vmul.f32 0.5, %v291_v5  ;;  %334 = vst [vmem:[%s724_s6 + $0x8] sm:$0xff] %v291_v5 }
 0x24d   :  { %v300_v7 = vmul.f32 1.442695, %v298_v6 }
 0x24f   :  { %517 = vpow2.f32 %v300_v7 }
 0x250   :  { %v277_v8 = vpop.f32.mrf.mxu3 }
 0x251   :  { %333 = vst [vmem:[%s724_s6] sm:$0xff] %v277_v8 }
 0x252   :  { %v293_v9 = vpop.f32.mrf.mxu1 }
 0x253   :  { %v299_v11 = vmul.f32 0.5, %v293_v9  ;;  %336 = vst [vmem:[%s724_s6 + $0x18] sm:$0xff] %v293_v9 }
 0x255   :  { %v518_v12 = vpop.eup %517  ;;  %v302_v13 = vmul.f32 1.442695, %v299_v11 }
 0x256   :  { %v304_v14 = vmul.f32 %v518_v12, %v296_v10 }
 0x257   :  { %519 = vpow2.f32 %v302_v13 }
 0x258   :  { %v306_v15 = vadd.f32 %v304_v14, %v277_v8  ;;  %v279_v16 = vpop.f32.mrf.mxu3 }
 0x259   :  { %335 = vst [vmem:[%s724_s6 + $0x10] sm:$0xff] %v279_v16  ;;  %s343_s6 = sshll.u32 %s607_s4, 4  ;;  %s344_s6 = int_to_ptr.vmem [resolvable:$true] %s343_s6 }
 0x25a   :  { %337 = vst [vmem:[#allocation6] sm:$0xff] %v306_v15 }
 0x25d   :  { %v520_v18 = vpop.eup %519 }
 0x25e   :  { %v305_v19 = vmul.f32 %v520_v18, %v297_v17 }
 0x260   :  { %v307_v20 = vadd.f32 %v305_v19, %v279_v16 }
 0x262   :  { %338 = vst [vmem:[#allocation6 + $0x8] sm:$0xff] %v307_v20  ;;  %v308_v21 = vpack.c.bf16 %v307_v20, %v306_v15 }
 0x263   :  { %366 = dma.vmem_to_hbm [thread:$0]  %s359_s15, 256, %s361_s18, [#allocation7], %s604_s29, %s604_s29, %s605_s30  }
 0x264   :  { %316 = vmatpush.bf16.xpose.msrb.mxu2 %v308_v21 }
 0x26b   :  { %317 = vmatmul.bf16.vlgmr.msrb.gmra.mxu2 %v308_v21 }
 0x2ee   :  { %v318_v22 = vpop.f32.mrf.mxu2 }
 0x2ef   :  { %v323_v23 = vmul.f32 0.5, %v318_v22 }
 0x2f1   :  { %521 = vtanh.f32 %v323_v23 }
 0x2f6   :  { %v320_v24 = vpop.f32.mrf.mxu2 }
 0x2f7   :  { %v522_v25 = vpop.eup %521  ;;  %v324_v26 = vmul.f32 0.5, %v320_v24 }
 0x2f8   :  { %v327_v27 = vadd.f32 1.0, %v522_v25 }
 0x2f9   :  { %523 = vtanh.f32 %v324_v26 }
 0x2fa   :  { %v329_v28 = vmul.f32 0.5, %v327_v27 }
 0x2fc   :  { %331 = vst.msk [vmem:[#allocation5] sm:$0xff] %vm136_vm0, %v329_v28 }
 0x2ff   :  { %v524_v29 = vpop.eup %523 }
 0x300   :  { %v328_v30 = vadd.f32 1.0, %v524_v29 }
 0x302   :  { %v330_v31 = vmul.f32 0.5, %v328_v30 }
 0x304   :  { %332 = vst.msk [vmem:[#allocation5 + $0x8] sm:$0xff] %vm136_vm0, %v330_v31 }
 0x305   :  { %351 = dma.vmem_to_hbm [thread:$0]  %s344_s6, 256, %s346_s20, [#allocation4], %s604_s29, %s604_s29, %s605_s30  }
 0x306   :  { %599 = dma.done.wait [#allocation4], 256  }
 0x307   :  { %600 = vsyncadd [#allocation4], 4294967040 }
 0x308   :  { %601 = dma.done.wait [#allocation7], 256  }
 0x309   :  { %602 = vsyncadd [#allocation7], 4294967040 }
 0x30a   :  { %377 = vsyncpa [#allocation3], 1 }
 0x30b   :  { %378 = vsyncpa [#allocation4], 1 }
 0x30c   :  { %379 = vsyncpa [#allocation7], 1 }

</bundles_post_ra>
